<compile_context>
chip_gen: v6e
topology: v6e:2x2x1
jax: 0.10.0
libtpu: 0.0.40
codegen_flags: <defaults>
</compile_context>

<pallas_src>
import jax
import jax.numpy as jnp
from jax.experimental import pallas as pl
from jax.experimental.pallas import tpu as pltpu


def _round_up(a: int, b: int) -> int:
    return ((a + b - 1) // b) * b


def _vmem_budget_bytes() -> int:
    # ~3/4 of physical VMEM: 96 MiB on v5e/v6e (128 MiB), 48 MiB on v7x (64 MiB).
    try:
        phys = int(pltpu.get_tpu_info().vmem_capacity_bytes)
    except Exception:
        phys = 64 * 1024 * 1024  # conservative fallback for any generation
    return max(16 * 1024 * 1024, (phys * 3) // 4)


def _exo_to_matrix_kernel(x_ref, w_ref, b_ref, o_ref):
    # x_ref: (TM, C)   flattened-token tile
    # w_ref: (C, TN)   pre-transposed weight tile (canonical MXU layout)
    # b_ref: (1, TN)   bias tile (broadcast over rows)
    # o_ref: (TM, TN)
    acc = jnp.dot(x_ref[...], w_ref[...], preferred_element_type=jnp.float32)
    o_ref[...] = (acc + b_ref[...]).astype(o_ref.dtype)


def prepare_exo_params(weight, bias):
    """One-time parameter prep (do at init, NOT every forward).

    weight: (N, C) in nn.Linear layout, bias: (N,).
    Returns (w_t, b2d): weight transposed+padded to (C, N_pad), bias padded to
    (1, N_pad), with N_pad a multiple of 128 for lane-dense stores.
    """
    N, C = weight.shape
    N_pad = _round_up(N, 128)
    w, b = weight, bias
    if N_pad != N:
        w = jnp.pad(weight, ((0, N_pad - N), (0, 0)))
        b = jnp.pad(bias, (0, N_pad - N))
    return jnp.transpose(w), b.reshape(1, N_pad)


def exo_to_matrix(x, w_t, b2d, base_dim, *, use_bf16=False):
    """Pallas equivalent of ExoToMatrix.forward.

    Args:
      x:        (B, T, C) float32
      w_t:      (C, N_pad) pre-transposed/padded weight from prepare_exo_params
      b2d:      (1, N_pad) padded bias
      base_dim: D (output matrices are D x D)
      use_bf16: cast x / weight to bf16 at the kernel boundary (f32 accumulate)

    Returns:
      (B, T, D, D) in x.dtype
    """
    B, T, C = x.shape
    Cw, N_pad = w_t.shape
    assert Cw == C
    N = base_dim * base_dim
    assert N <= N_pad and b2d.shape == (1, N_pad)

    M = B * T
    x_flat = x.reshape(M, C)

    if use_bf16:
        x_flat = x_flat.astype(jnp.bfloat16)
        w_t = w_t.astype(jnp.bfloat16)
    xb = jnp.dtype(x_flat.dtype).itemsize          # x / weight element size
    ob = jnp.dtype(x.dtype).itemsize               # output element size
    bb = jnp.dtype(b2d.dtype).itemsize

    # ---- generation-aware VMEM budget & tile sizes --------------------------
    budget = _vmem_budget_bytes()
    usable = (budget * 17) // 20                   # leave slack for compiler scratch
    tm_cap = 2048 if budget >= 72 * 1024 * 1024 else 1024   # v5e/v6e vs v7x

    # Resident-parameter cost assumes default double-buffering (pipeline still
    # only DMAs them once because the block index never changes).
    full_w_cost = 2 * C * N_pad * xb + 2 * N_pad * bb
    one_d = full_w_cost <= usable // 2

    if one_d:
        TN = N_pad
        param_cost = full_w_cost
    else:
        TN = 128
        for cand in (512, 256, 128):
            if N_pad % cand == 0 and 2 * C * cand * xb + 2 * cand * bb <= usable // 2:
                TN = cand
                break
        param_cost = 2 * C * TN * xb + 2 * TN * bb

    # Double-buffered x and out tiles, per row of TM.
    per_row = 2 * C * xb + 2 * TN * ob
    tm_max = max(8, (usable - param_cost) // per_row)
    TM = max(8, min(tm_cap, (tm_max // 8) * 8, _round_up(M, 8)))

    # ---- grid / specs --------------------------------------------------------
    if one_d:
        grid = (pl.cdiv(M, TM),)
        in_specs = [
            pl.BlockSpec((TM, C), lambda i: (i, 0)),        # x tile (pipelined)
            pl.BlockSpec((C, N_pad), lambda i: (0, 0)),     # weight: DMA'd once, resident
            pl.BlockSpec((1, N_pad), lambda i: (0, 0)),     # bias:   DMA'd once, resident
        ]
        out_specs = pl.BlockSpec((TM, N_pad), lambda i: (i, 0))
        dims = ("parallel",)                                # v7x: M loop split across both TCs
    else:
        # N-tiles outer, M-tiles inner: weight tile resident across the M loop.
        grid = (N_pad // TN, pl.cdiv(M, TM))
        in_specs = [
            pl.BlockSpec((TM, C), lambda j, i: (i, 0)),
            pl.BlockSpec((C, TN), lambda j, i: (0, j)),
            pl.BlockSpec((1, TN), lambda j, i: (0, j)),
        ]
        out_specs = pl.BlockSpec((TM, TN), lambda j, i: (i, j))
        dims = ("parallel", "parallel")

    cost = pl.CostEstimate(
        flops=2 * M * C * N_pad,
        transcendentals=0,
        bytes_accessed=xb * M * C + xb * C * N_pad + bb * N_pad + ob * M * N_pad,
    )

    out_flat = pl.pallas_call(
        _exo_to_matrix_kernel,
        out_shape=jax.ShapeDtypeStruct((M, N_pad), x.dtype),
        grid=grid,
        in_specs=in_specs,
        out_specs=out_specs,
        compiler_params=pltpu.CompilerParams(
            dimension_semantics=dims,
            vmem_limit_bytes=int(budget),
        ),
        cost_estimate=cost,
    )(x_flat, w_t, b2d)

    if N_pad != N:
        out_flat = out_flat[:, :N]
    return out_flat.reshape(B, T, base_dim, base_dim)


if __name__ == "__main__":
    # Small shapes consistent with the module's forward.
    B, T = 2, 8
    exo_dim = 32
    base_dim = 16          # linear out_features = 256, output matrices (16, 16)

    key = jax.random.PRNGKey(0)
    kx, kw, kb = jax.random.split(key, 3)

    x = jax.random.normal(kx, (B, T, exo_dim), dtype=jnp.float32)
    # Deterministic params (mimics nn.Linear's uniform(-1/sqrt(C), 1/sqrt(C))).
    bound = 1.0 / jnp.sqrt(jnp.float32(exo_dim))
    weight = jax.random.uniform(
        kw, (base_dim * base_dim, exo_dim), dtype=jnp.float32,
        minval=-bound, maxval=bound)
    bias = jax.random.uniform(
        kb, (base_dim * base_dim,), dtype=jnp.float32,
        minval=-bound, maxval=bound)

    # One-time parameter prep (pad N to 128 multiple, transpose to (C, N_pad)).
    w_t, b2d = prepare_exo_params(weight, bias)

    out = exo_to_matrix(x, w_t, b2d, base_dim)
    out = jax.block_until_ready(out)

    # Reference check in plain JAX.
    ref = (x.reshape(B * T, exo_dim) @ weight.T + bias).reshape(
        B, T, base_dim, base_dim)
    assert out.shape == (B, T, base_dim, base_dim)
    assert jnp.allclose(out, ref, atol=1e-4, rtol=1e-4)

    print("KERNEL_OK")
</pallas_src>

<mosaic_0001>
module attributes {stable_mosaic.version = 11 : i64} {
  func.func @_exo_to_matrix_kernel(%arg0: i32, %arg1: memref<16x32xf32, #tpu.memory_space<vmem>>, %arg2: memref<32x256xf32, #tpu.memory_space<vmem>>, %arg3: memref<1x256xf32, #tpu.memory_space<vmem>>, %arg4: memref<16x256xf32, #tpu.memory_space<vmem>>) attributes {dimension_semantics = [#tpu.dimension_semantics<parallel>], iteration_bounds = array<i64: 1>, scalar_prefetch = 0 : i64, scratch_operands = 0 : i64, tpu.core_type = #tpu.core_type<tc>, window_params = [{transform_indices = @transform_0, window_bounds = array<i64: 16, 32>}, {pipeline_mode = #tpu.pipeline_mode<synchronous>, transform_indices = @transform_1, window_bounds = array<i64: 32, 256>}, {pipeline_mode = #tpu.pipeline_mode<synchronous>, transform_indices = @transform_2, window_bounds = array<i64: 1, 256>}, {transform_indices = @transform_3, window_bounds = array<i64: 16, 256>}]} {
    %c0 = arith.constant 0 : index
    %c0_0 = arith.constant 0 : index
    %0 = vector.load %arg1[%c0, %c0_0] : memref<16x32xf32, #tpu.memory_space<vmem>>, vector<16x32xf32>
    %c0_1 = arith.constant 0 : index
    %c0_2 = arith.constant 0 : index
    %1 = vector.load %arg2[%c0_1, %c0_2] : memref<32x256xf32, #tpu.memory_space<vmem>>, vector<32x256xf32>
    %cst = arith.constant dense<0.000000e+00> : vector<16x256xf32>
    %2 = tpu.matmul %0, %1, %cst {dimension_numbers = #tpu.dot_dimension_numbers<[1], [0], [0], [1], [0, 0, 1, 1], [], []>} : vector<16x32xf32>, vector<32x256xf32>, vector<16x256xf32> -> vector<16x256xf32>
    %c0_3 = arith.constant 0 : index
    %c0_4 = arith.constant 0 : index
    %3 = vector.load %arg3[%c0_3, %c0_4] : memref<1x256xf32, #tpu.memory_space<vmem>>, vector<1x256xf32>
    %4 = vector.broadcast %3 : vector<1x256xf32> to vector<16x256xf32>
    %5 = arith.addf %2, %4 : vector<16x256xf32>
    %c0_5 = arith.constant 0 : index
    %c0_6 = arith.constant 0 : index
    %6 = vector.load %arg4[%c0_5, %c0_6] : memref<16x256xf32, #tpu.memory_space<vmem>>, vector<16x256xf32>
    tpu.vector_store %arg4[%c0_5, %c0_6], %5 {strides = array<i32>} : memref<16x256xf32, #tpu.memory_space<vmem>>, vector<16x256xf32>,
    return
  }
  func.func @transform_0(%arg0: i32) -> (i32, i32) {
    %c0_i32 = arith.constant 0 : i32
    %c0_i32_0 = arith.constant 0 : i32
    return %arg0, %c0_i32 : i32, i32
  }
  func.func @transform_1(%arg0: i32) -> (i32, i32) {
    %c0_i32 = arith.constant 0 : i32
    %c0_i32_0 = arith.constant 0 : i32
    %c0_i32_1 = arith.constant 0 : i32
    return %c0_i32, %c0_i32_0 : i32, i32
  }
  func.func @transform_2(%arg0: i32) -> (i32, i32) {
    %c0_i32 = arith.constant 0 : i32
    %c0_i32_0 = arith.constant 0 : i32
    %c0_i32_1 = arith.constant 0 : i32
    return %c0_i32, %c0_i32_0 : i32, i32
  }
  func.func @transform_3(%arg0: i32) -> (i32, i32) {
    %c0_i32 = arith.constant 0 : i32
    %c0_i32_0 = arith.constant 0 : i32
    return %arg0, %c0_i32 : i32, i32
  }
}

</mosaic_0001>

<bundles_post_ra>
// kernel: tpu_custom_call.1
= control target key start
LH: loop header
LB: loop body
LE: loop exit
PB: predicated region body
PF: predicated region fallthrough
CT: control target
= control target key end

     0   :  { %8 = vsyncpa [#allocation3], 0  ;;  %s301_s0 = inlined_call_operand.hbm [shape: f32[16,32], index: 0, kind: input, shape index: {}]   ;;  %s302_s1 = inlined_call_operand.hbm [shape: f32[32,256], index: 1, kind: input, shape index: {}]   ;;  %s303_s2 = inlined_call_operand.vmem [shape: f32[1,256], index: 2, kind: input, shape index: {}]   ;;  %s304_s3 = inlined_call_operand.hbm [shape: f32[16,256], index: 3, kind: output, shape index: {}]  }
   0x1   :  { %9 = vsyncpa [#allocation6], 0 }
   0x2   :  { %10 = vsyncpa [#allocation4], 0  ;;  %s255_s12 = smov [#allocation2]  }
   0x3   :  { %s16_s13 = sshll.u32 %s255_s12, 4  ;;  %s17_s13 = int_to_ptr.vmem [resolvable:$true] %s16_s13 }
   0x4   :  { %s197_s14 = scalar_lea.vmem %s17_s13, 256  ;;  %p202_p1 = scmp.lt.s32.totalorder %s17_s13, %s17_s13 }
   0x5   :  { %p198_p0 = scmp.ne.s32.totalorder %s17_s13, %s197_s14  ;;  %p203_p2 = scmp.lt.s32.totalorder %s197_s14, %s197_s14 }
   0x7   :  { %p204_p3 = por %p203_p2, %p202_p1 }
   0x9   :  { %p205_p4 = pnand %p204_p3, %p198_p0 }
   0xb   :  { %208 = shalt.err (!%p205_p4)
}
   0xc   :  { %s256_s15 = smov 128   ;;  %s257_s16 = smov 8  }
   0xd   :  { %22 = dma.hbm_to_vmem [thread:$0]  %s301_s0, 256, %s17_s13, [#allocation3], %s256_s15, %s256_s15, %s257_s16  }
   0xe   :  { %s258_s19 = smov [#allocation5]  }
   0xf   :  { %s28_s20 = sshll.u32 %s258_s19, 4  ;;  %s29_s20 = int_to_ptr.vmem [resolvable:$true] %s28_s20 }
  0x10   :  { %s217_s21 = scalar_lea.vmem %s29_s20, 1024  ;;  %p222_p6 = scmp.lt.s32.totalorder %s29_s20, %s29_s20 }
  0x11   :  { %p218_p5 = scmp.ne.s32.totalorder %s29_s20, %s217_s21  ;;  %p223_p7 = scmp.lt.s32.totalorder %s217_s21, %s217_s21 }
  0x13   :  { %p224_p8 = por %p223_p7, %p222_p6 }
  0x15   :  { %p225_p9 = pnand %p224_p8, %p218_p5 }
  0x17   :  { %228 = shalt.err (!%p225_p9)
}
  0x18   :  { %s259_s22 = smov 256   ;;  %s260_s23 = smov 16  }
  0x19   :  { %34 = dma.hbm_to_vmem [thread:$0]  %s302_s1, 1024, %s29_s20, [#allocation6], %s259_s22, %s259_s22, %s260_s23  }
  0x1a   :  { %249 = dma.done.wait [#allocation3], 256  }
  0x1b   :  { %250 = vsyncadd [#allocation3], 4294967040 }
  0x1c   :  { %251 = dma.done.wait [#allocation6], 1024  }
  0x1d   :  { %252 = vsyncadd [#allocation6], 4294966272  ;;  %v261_v0 = vmov 0.0   ;;  %v52_v1 = vld [vmem:[#allocation5 + $0x38] sm:$0xff]  ;;  %v51_v2 = vld [vmem:[#allocation5 + $0x30] sm:$0xff]  ;;  %vm65_vm0 = vcmask 261120   ;;  %v55_v11 = vlaneseq }
  0x1e   :  { %136 = vmatprep.mubr.f32.mxu0 %v261_v0  ;;  %142 = vmatprep.mubr.f32.mxu1 %v261_v0  ;;  %v50_v3 = vld [vmem:[#allocation5 + $0x28] sm:$0xff]  ;;  %v49_v4 = vld [vmem:[#allocation5 + $0x20] sm:$0xff]  ;;  %v48_v5 = vld [vmem:[#allocation5 + $0x18] sm:$0xff]  ;;  %s262_s26 = smov [#allocation7]  }
  0x1f   :  { %96 = vmatprep.subr.mxu0 %v52_v1  ;;  %173 = vmatprep.subr.mxu1 %v52_v1  ;;  %v47_v6 = vld [vmem:[#allocation5 + $0x10] sm:$0xff]  ;;  %v46_v7 = vld [vmem:[#allocation5 + $0x8] sm:$0xff]  ;;  %v45_v8 = vld [vmem:[#allocation5] sm:$0xff]  ;;  %v56_v12 = vshrl.u32 %v55_v11, 7  ;;  %s158_s27 = sshll.u32 %s262_s26, 4  ;;  %s159_s27 = int_to_ptr.vmem [resolvable:$true] %s158_s27 }
  0x20   :  { %97 = vmatpush1.msra.mxu0 %v51_v2  ;;  %177 = vmatpush1.msra.mxu1 %v51_v2  ;;  %v43_v9 = vld [vmem:[#allocation2] sm:$0xff]  ;;  %v44_v10 = vld [vmem:[#allocation2 + $0x8] sm:$0xff]  ;;  %s229_s28 = scalar_lea.vmem %s159_s27, 512  ;;  %p234_p11 = scmp.lt.s32.totalorder %s159_s27, %s159_s27 }
  0x21   :  { %98 = vmatprep.subr.mxu0 %v50_v3  ;;  %174 = vmatprep.subr.mxu1 %v50_v3  ;;  %v57_v13 = vsub.s32 0, %v56_v12  ;;  %v53_v14 = vld [vmem:[%s303_s2] sm:$0x3]  ;;  %v61_v15 = vsub.s32 1, %v56_v12  ;;  %p230_p10 = scmp.ne.s32.totalorder %s159_s27, %s229_s28  ;;  %p235_p12 = scmp.lt.s32.totalorder %s229_s28, %s229_s28 }
  0x22   :  { %99 = vmatpush1.msra.mxu0 %v49_v4  ;;  %178 = vmatpush1.msra.mxu1 %v49_v4 }
  0x23   :  { %100 = vmatprep.subr.mxu0 %v48_v5  ;;  %175 = vmatprep.subr.mxu1 %v48_v5  ;;  %v58_v16 = vrot.slane %v53_v14, %v57_v13  ;;  %v62_v17 = vrot.slane %v53_v14, %v61_v15  ;;  %p236_p13 = por %p235_p12, %p234_p11 }
  0x24   :  { %101 = vmatpush1.msra.mxu0 %v47_v6  ;;  %179 = vmatpush1.msra.mxu1 %v47_v6 }
  0x25   :  { %102 = vmatprep.subr.mxu0 %v46_v7  ;;  %176 = vmatprep.subr.mxu1 %v46_v7  ;;  %p237_p0 = pnand %p236_p13, %p230_p10 }
  0x26   :  { %103 = vmatpush1.msra.mxu0 %v45_v8  ;;  %180 = vmatpush1.msra.mxu1 %v45_v8 }
  0x27   :  { %171 = vmatmul.mubr.msk.f32.vlgmr.msra.gmra.mxu0 %vm65_vm0, %v43_v9  ;;  %172 = vmatmul.mubr.msk.f32.vlgmr.msra.gmra.mxu1 %vm65_vm0, %v44_v10 }
  0xe7   :  { %v138_v18 = vpop.f32.mrf.mxu0  ;;  %v144_v19 = vpop.f32.mrf.mxu1 }
  0xe8   :  { %v139_v20 = vadd.f32 %v138_v18, %v58_v16  ;;  %v145_v21 = vadd.f32 %v144_v19, %v58_v16 }
  0xe9   :  { %v140_v22 = vpop.f32.mrf.mxu0  ;;  %v146_v23 = vpop.f32.mrf.mxu1 }
  0xea   :  { %149 = vst [vmem:[#allocation7] sm:$0xff] %v139_v20  ;;  %151 = vst [vmem:[#allocation7 + $0x10] sm:$0xff] %v145_v21  ;;  %v141_v24 = vadd.f32 %v140_v22, %v62_v17  ;;  %v147_v25 = vadd.f32 %v146_v23, %v62_v17 }
  0xec   :  { %150 = vst [vmem:[#allocation7 + $0x8] sm:$0xff] %v141_v24  ;;  %152 = vst [vmem:[#allocation7 + $0x18] sm:$0xff] %v147_v25 }
  0xed   :  { %240 = shalt.err (!%p237_p0)
}
  0xee   :  { %164 = dma.vmem_to_hbm [thread:$0]  %s159_s27, 512, %s304_s3, [#allocation4], %s259_s22, %s259_s22, %s260_s23  }
  0xef   :  { %253 = dma.done.wait [#allocation4], 512  }
  0xf0   :  { %254 = vsyncadd [#allocation4], 4294966784 }
  0xf1   :  { %168 = vsyncpa [#allocation3], 1 }
  0xf2   :  { %169 = vsyncpa [#allocation6], 1 }
  0xf3   :  { %170 = vsyncpa [#allocation4], 1 }

</bundles_post_ra>
